<compile_context>
chip_gen: v7x
topology: tpu7x:2x2x1
jax: 0.10.0
libtpu: 0.0.40
codegen_flags: <defaults>
</compile_context>

<pallas_src>
import jax
import jax.numpy as jnp
from jax.experimental import pallas as pl
from jax.experimental.pallas import tpu as pltpu


def _scale_kernel(a_ref, x_ref, o_ref):
    # a_ref: (1, 1) float32 scalar in SMEM; x_ref / o_ref: VMEM row tiles.
    # Cast the scalar once to the tile dtype -> native-dtype multiply (bf16
    # stays packed on v6e/v7x; no-op for f32).
    a = a_ref[0, 0].astype(x_ref.dtype)
    o_ref[...] = (a * x_ref[...]).astype(o_ref.dtype)


_TARGET_TILE_BYTES = 4 * 1024 * 1024     # ~4 MiB row tiles (see header notes)
_VMEM_LIMIT_BYTES = 32 * 1024 * 1024     # > 4x tile bytes; fits every TPU gen
_SUBLANE_MIN = {4: 8, 2: 16, 1: 32}      # dtype-aware sublane multiple


def _pick_tile_rows(rows, lane, itemsize):
    """Row-tile size near the byte target, preferring an exact divisor of rows."""
    sub = _SUBLANE_MIN.get(itemsize, 8)
    target = max(sub, _TARGET_TILE_BYTES // (lane * itemsize))
    target = max(sub, (target // sub) * sub)
    if rows <= target:
        return rows                       # single full-extent block (always legal)
    # Prefer a sublane-aligned divisor of rows so every grid step is full-width
    # (unmasked vst, full-size DMAs). Only accept divisors >= target/2.
    for cand in range(target, sub - 1, -sub):
        if rows % cand == 0 and cand * 2 >= target:
            return cand
    return target                         # ragged last tile handled by block masking


def sample_net_forward(a_scalar, x, donate_x=False):
    """Compute a * x elementwise via a Pallas TPU kernel. x may be any shape."""
    orig_shape = x.shape
    n = x.size
    dtype = x.dtype
    if n == 0:
        return x
    x_flat = x.reshape(-1)                # metadata-only reshape (row-major)

    if n % 128 != 0:
        # Tail path: kernel on the 128-aligned bulk, trivial XLA multiply on the
        # small remainder. Avoids the full padded-input copy + output slice a
        # pad-based fallback would cost.
        bulk = (n // 128) * 128
        a_t = jnp.asarray(a_scalar, dtype=dtype)
        if bulk == 0:
            return (a_t * x_flat).reshape(orig_shape)
        head = sample_net_forward(a_scalar, x_flat[:bulk])
        tail = a_t * x_flat[bulk:]
        return jnp.concatenate([head, tail]).reshape(orig_shape)

    # Widest lane-dense last dim (multiple of 128) that divides the flat size.
    lane = 128
    for cand in (4096, 2048, 1024, 512, 256):
        if n % cand == 0:
            lane = cand
            break

    rows = n // lane
    x2d = x_flat.reshape(rows, lane)

    itemsize = jnp.dtype(dtype).itemsize
    tile_r = _pick_tile_rows(rows, lane, itemsize)
    grid = (pl.cdiv(rows, tile_r),)

    # Scalar parameter kept as float32 (1,1) on the SMEM 32-bit scalar path.
    a_arr = jnp.asarray(a_scalar, dtype=jnp.float32).reshape(1, 1)

    out2d = pl.pallas_call(
        _scale_kernel,
        out_shape=jax.ShapeDtypeStruct((rows, lane), dtype),
        grid_spec=pltpu.PrefetchScalarGridSpec(
            num_scalar_prefetch=0,
            grid=grid,
            in_specs=[
                pl.BlockSpec(memory_space=pltpu.MemorySpace.SMEM),   # scalar a
                pl.BlockSpec((tile_r, lane), lambda i: (i, 0)),      # x row tile
            ],
            out_specs=pl.BlockSpec((tile_r, lane), lambda i: (i, 0)),
        ),
        compiler_params=pltpu.CompilerParams(
            dimension_semantics=("parallel",),   # megacore sharding on v7x
            vmem_limit_bytes=_VMEM_LIMIT_BYTES,
        ),
        input_output_aliases=({1: 0} if donate_x else {}),
    )(a_arr, x2d)

    return out2d.reshape(orig_shape)


if __name__ == "__main__":
    key = jax.random.PRNGKey(0)
    k_a, k_x = jax.random.split(key)

    # Deterministic parameter init mirroring torch.nn.Parameter(torch.randn(()))
    a_param = jax.random.normal(k_a, (), dtype=jnp.float32)

    # Small NCHW input consistent with the forward.
    x = jax.random.normal(k_x, (2, 4, 16, 16), dtype=jnp.float32)

    out = jax.block_until_ready(sample_net_forward(a_param, x))

    # Sanity check against the reference semantics: out == a * x
    ref = a_param * x
    assert out.shape == x.shape
    assert jnp.allclose(out, ref, atol=1e-6, rtol=1e-6)

    print("KERNEL_OK")
</pallas_src>

<mosaic_0001>
module attributes {stable_mosaic.version = 11 : i64} {
  func.func @_scale_kernel(%arg0: i32, %arg1: memref<1x1xf32, #tpu.memory_space<smem>>, %arg2: memref<1x2048xf32, #tpu.memory_space<vmem>>, %arg3: memref<1x2048xf32, #tpu.memory_space<vmem>>) attributes {dimension_semantics = [#tpu.dimension_semantics<parallel>], iteration_bounds = array<i64: 1>, scalar_prefetch = 0 : i64, scratch_operands = 0 : i64, tpu.core_type = #tpu.core_type<tc>, window_params = [{transform_indices = @transform_0, window_bounds = array<i64: 1, 1>}, {transform_indices = @transform_1, window_bounds = array<i64: 1, 2048>}, {transform_indices = @transform_2, window_bounds = array<i64: 1, 2048>}]} {
    %c0 = arith.constant 0 : index
    %c0_0 = arith.constant 0 : index
    %0 = memref.load %arg1[%c0, %c0_0] : memref<1x1xf32, #tpu.memory_space<smem>>
    %c0_1 = arith.constant 0 : index
    %c0_2 = arith.constant 0 : index
    %1 = vector.load %arg2[%c0_1, %c0_2] : memref<1x2048xf32, #tpu.memory_space<vmem>>, vector<1x2048xf32>
    %2 = vector.broadcast %0 : f32 to vector<1x2048xf32>
    %3 = arith.mulf %2, %1 : vector<1x2048xf32>
    %c0_3 = arith.constant 0 : index
    %c0_4 = arith.constant 0 : index
    %4 = vector.load %arg3[%c0_3, %c0_4] : memref<1x2048xf32, #tpu.memory_space<vmem>>, vector<1x2048xf32>
    tpu.vector_store %arg3[%c0_3, %c0_4], %3 {strides = array<i32>} : memref<1x2048xf32, #tpu.memory_space<vmem>>, vector<1x2048xf32>,
    return
  }
  func.func @transform_0(%arg0: i32) -> (i32, i32) {
    %c0_i32 = arith.constant 0 : i32
    %c0_i32_0 = arith.constant 0 : i32
    %c0_i32_1 = arith.constant 0 : i32
    return %c0_i32, %c0_i32_0 : i32, i32
  }
  func.func @transform_1(%arg0: i32) -> (i32, i32) {
    %c0_i32 = arith.constant 0 : i32
    %c0_i32_0 = arith.constant 0 : i32
    return %arg0, %c0_i32 : i32, i32
  }
  func.func @transform_2(%arg0: i32) -> (i32, i32) {
    %c0_i32 = arith.constant 0 : i32
    %c0_i32_0 = arith.constant 0 : i32
    return %arg0, %c0_i32 : i32, i32
  }
}

</mosaic_0001>

<bundles_post_ra>
// kernel: tpu_custom_call.1
= control target key start
LH: loop header
LB: loop body
LE: loop exit
PB: predicated region body
PF: predicated region fallthrough
CT: control target
= control target key end

     0   :  { %8 = vsyncpa [#allocation4], 0  ;;  %s142_s0 = inlined_call_operand.<no memory space> [shape: f32[1,1], index: 0, kind: input, shape index: {}]   ;;  %s143_s1 = inlined_call_operand.hbm [shape: f32[1,2048], index: 1, kind: input, shape index: {}]   ;;  %s144_s2 = inlined_call_operand.hbm [shape: f32[1,2048], index: 2, kind: output, shape index: {}]  }
   0x1   :  { %9 = vsyncpa [#allocation5], 0  ;;  %s98_s9 = smov [#allocation3]   ;;  %s50_s13 = scalar_lea.hbm %s143_s1, 256 }
   0x2   :  { %s18_s10 = sshll.u32 %s98_s9, 4  ;;  %p51_p0 = scmp.ne.s32.totalorder %s143_s1, %s50_s13  ;;  %s19_s10 = int_to_ptr.vmem [resolvable:$true] %s18_s10 }
   0x3   :  { %p54_p1 = scmp.lt.u32.totalorder %s50_s13, %s143_s1 }
   0x5   :  { %p56_p2 = pnand %p54_p1, %p51_p0 }
   0x7   :  { %59 = shalt.err (!%p56_p2)
}
   0x8   :  { %s60_s18 = scalar_lea.vmem %s19_s10, 256  ;;  %p65_p4 = scmp.lt.s32.totalorder %s19_s10, %s19_s10 }
   0x9   :  { %p61_p3 = scmp.ne.s32.totalorder %s19_s10, %s60_s18  ;;  %p66_p5 = scmp.lt.s32.totalorder %s60_s18, %s60_s18 }
   0xb   :  { %p67_p6 = por %p66_p5, %p65_p4 }
   0xd   :  { %p68_p7 = pnand %p67_p6, %p61_p3 }
   0xf   :  { %71 = shalt.err (!%p68_p7)
}
  0x10   :  { %21 = dma.hbm_to_vmem [thread:$0]  %s143_s1, 256, %s19_s10, [#allocation4]  }
  0x11   :  { %94 = dma.done.wait [#allocation4], 256  }
  0x12   :  { %95 = vsyncadd [#allocation4], 4294967040  ;;  %v28_v0 = vstv %s142_s0  ;;  %s99_s23 = smov [#allocation6]   ;;  %v26_v1 = vld [vmem:[#allocation3] sm:$0xff]  ;;  %v27_v2 = vld [vmem:[#allocation3 + $0x8] sm:$0xff] }
  0x13   :  { %s39_s24 = sshll.u32 %s99_s23, 4  ;;  %v29_v3 = vmul.f32 %v28_v0, %v26_v1  ;;  %v30_v4 = vmul.f32 %v28_v0, %v27_v2  ;;  %s40_s24 = int_to_ptr.vmem [resolvable:$true] %s39_s24 }
  0x14   :  { %s72_s25 = scalar_lea.vmem %s40_s24, 256  ;;  %p77_p9 = scmp.lt.s32.totalorder %s40_s24, %s40_s24 }
  0x15   :  { %31 = vst [vmem:[#allocation6] sm:$0xff] %v29_v3  ;;  %32 = vst [vmem:[#allocation6 + $0x8] sm:$0xff] %v30_v4  ;;  %p73_p8 = scmp.ne.s32.totalorder %s40_s24, %s72_s25  ;;  %p78_p10 = scmp.lt.s32.totalorder %s72_s25, %s72_s25 }
  0x17   :  { %p79_p11 = por %p78_p10, %p77_p9 }
  0x19   :  { %p80_p12 = pnand %p79_p11, %p73_p8 }
  0x1b   :  { %83 = shalt.err (!%p80_p12)
}
  0x1c   :  { %s84_s0 = scalar_lea.hbm %s144_s2, 256 }
  0x1d   :  { %p85_p13 = scmp.ne.s32.totalorder %s144_s2, %s84_s0  ;;  %p88_p0 = scmp.lt.u32.totalorder %s84_s0, %s144_s2 }
  0x1f   :  { %p90_p1 = pnand %p88_p0, %p85_p13 }
  0x21   :  { %93 = shalt.err (!%p90_p1)
}
  0x22   :  { %42 = dma.vmem_to_hbm [thread:$0]  %s40_s24, 256, %s144_s2, [#allocation5]  }
  0x23   :  { %96 = dma.done.wait [#allocation5], 256  }
  0x24   :  { %97 = vsyncadd [#allocation5], 4294967040 }
  0x25   :  { %46 = vsyncpa [#allocation4], 1 }
  0x26   :  { %47 = vsyncpa [#allocation5], 1 }

</bundles_post_ra>
